<compile_context>
chip_gen: v5e
topology: v5e:2x2
jax: 0.10.0
libtpu: 0.0.40
codegen_flags: <defaults>
</compile_context>

<pallas_src>
import functools

import numpy as np

import jax
import jax.numpy as jnp
from jax.experimental import pallas as pl
from jax.experimental.pallas import tpu as pltpu

_LANE = 128
_SUBLANE = 8


def _stencil_kernel(x_ref, *out_refs, taps_per_out, hw):
    """Fused shift-and-accumulate stencils over a (rows, H*W) lane-dense slab.

    x is loaded once and shared by every output.  Each output has its own
    compile-time taps tuple of (flat_shift, weight) pairs, with the weight
    already scaled by 1/resol and zero taps dropped.  One XLU roll per tap.
    """
    x_raw = x_ref[...]
    x_f32 = None
    for o_ref, taps in zip(out_refs, taps_per_out):
        if x_raw.dtype == jnp.bfloat16 and len(taps) <= 2:
            x = x_raw                       # bf16-native VPU path (v6e/v7x)
        else:
            if x_f32 is None:
                x_f32 = x_raw.astype(jnp.float32)
            x = x_f32
        acc = None
        for shift, w in taps:
            shifted = pltpu.roll(x, (-shift) % hw, axis=1) if shift else x
            term = shifted * w
            acc = term if acc is None else acc + term
        if acc is None:                     # all-zero filter
            acc = jnp.zeros_like(x)
        o_ref[...] = acc.astype(o_ref.dtype)


def _row_tile(n_rows, hw, itemsize, target_bytes=4 << 20):
    """Largest multiple-of-8 divisor of n_rows whose (rows, hw) block fits
    ~target_bytes; falls back to the full extent (always a legal block)."""
    if n_rows % _SUBLANE != 0:
        return n_rows
    best = None
    for tb in range(_SUBLANE, n_rows + 1, _SUBLANE):
        if n_rows % tb == 0 and tb * hw * itemsize <= target_bytes:
            best = tb
    return best if best is not None else _SUBLANE


def conv2d_derivatives(x, filters_and_resols):
    """Fused Pallas equivalent of several Conv2dDerivative modules sharing x.

    x:                  (N, 1, H, W)
    filters_and_resols: sequence of (der_filter, resol); der_filter is the
                        frozen (1, 1, k, k) filter (concrete values), resol a
                        concrete Python scalar.
    Returns: tuple of (N, 1, H-k+1, W-k+1) arrays, one per filter
             (= VALID cross-correlation / resol).
    """
    N, C, H, W = x.shape
    assert C == 1, "Conv2dDerivative has input_channels = 1"
    HW = H * W

    # TODO(synk): der_filter / resol must be concrete at trace time (they are
    # frozen module constants); a traced filter would need an SMEM input path.
    taps_per_out = []
    out_geom = []
    for der_filter, resol in filters_and_resols:
        w_np = np.asarray(jax.device_get(der_filter), dtype=np.float64)
        oc, ic, k, k2 = w_np.shape
        assert oc == 1 and ic == 1 and k == k2
        Ho, Wo = H - k + 1, W - k + 1
        assert Ho > 0 and Wo > 0
        w_scaled = w_np[0, 0] / float(resol)    # fold 1/resol into the taps
        taps = tuple(
            (di * W + dj, float(w_scaled[di, dj]))
            for di in range(k)
            for dj in range(k)
            if w_scaled[di, dj] != 0.0
        )
        taps_per_out.append(taps)
        out_geom.append((Ho, Wo))

    # Lane-dense slab with NO HBM-side padding.
    x_slab = x.reshape(N, HW)

    # Batch-row tiling (halo-free: rolls stay within each sublane row).
    tb = _row_tile(N, HW, x.dtype.itemsize)
    grid = (N // tb,)

    n_out = len(taps_per_out)
    kernel = functools.partial(
        _stencil_kernel, taps_per_out=tuple(taps_per_out), hw=HW)

    block = pl.BlockSpec((tb, HW), lambda i: (i, 0))

    # VMEM budget: (1 in + n_out out) blocks x 2 pipeline buffers (default
    # depth — the kernel is HBM-bound, deeper buffering would not help) plus
    # ~3 slab-sized f32 temporaries (shifted/term/acc).
    vmem_est = ((1 + n_out) * 2) * tb * HW * x.dtype.itemsize + 3 * tb * HW * 4
    vmem_limit = None
    if vmem_est > (16 << 20):
        vmem_limit = min(int(vmem_est * 3 // 2), 96 << 20)

    out_slabs = pl.pallas_call(
        kernel,
        grid=grid,
        out_shape=tuple(
            jax.ShapeDtypeStruct((N, HW), x.dtype) for _ in range(n_out)),
        in_specs=[block],
        out_specs=tuple(block for _ in range(n_out)),
        compiler_params=pltpu.CompilerParams(
            dimension_semantics=("parallel",),
            vmem_limit_bytes=vmem_limit),
    )(x_slab)
    if n_out == 1 and not isinstance(out_slabs, (tuple, list)):
        out_slabs = (out_slabs,)

    # Lane-dense kernel outputs; the single valid-window slice is deferred to
    # the end of the graph (Wo < 128 would force masked stores in-kernel).
    outs = []
    for slab, (Ho, Wo) in zip(out_slabs, out_geom):
        outs.append(slab.reshape(N, 1, H, W)[:, :, :Ho, :Wo])
    return tuple(outs)


def conv2d_derivative(x, der_filter, resol):
    """Pallas equivalent of Conv2dDerivative.forward (single filter)."""
    return conv2d_derivatives(x, [(der_filter, resol)])[0]


if __name__ == "__main__":
    key = jax.random.PRNGKey(0)

    # Small shapes consistent with the module: batch=2, 1 channel, 16x16 grid.
    N, C, H, W = 2, 1, 16, 16
    dx = 2.0 / 16.0

    # PhyCRNet-style central-difference / laplacian derivative filters.
    ddx_f = jnp.array([[[[0.0, 0.0, 0.0],
                         [-0.5, 0.0, 0.5],
                         [0.0, 0.0, 0.0]]]], dtype=jnp.float32)
    ddy_f = jnp.array([[[[0.0, -0.5, 0.0],
                         [0.0, 0.0, 0.0],
                         [0.0, 0.5, 0.0]]]], dtype=jnp.float32)
    lap_f = jnp.array([[[[0.0, 1.0, 0.0],
                         [1.0, -4.0, 1.0],
                         [0.0, 1.0, 0.0]]]], dtype=jnp.float32)

    x = jax.random.normal(key, (N, C, H, W), dtype=jnp.float32)

    # Single-module forward (exactly Conv2dDerivative.forward).
    out_dx = conv2d_derivative(x, ddx_f, dx)
    out_dx = jax.block_until_ready(out_dx)

    # Fused forward for the three PhyCRNet derivative operators (one load of x).
    out_dx_f, out_dy_f, out_lap_f = conv2d_derivatives(
        x, [(ddx_f, dx), (ddy_f, dx), (lap_f, dx * dx)])
    jax.block_until_ready((out_dx_f, out_dy_f, out_lap_f))

    def ref(x, f, r):
        return jax.lax.conv_general_dilated(
            x, f, window_strides=(1, 1), padding="VALID",
            dimension_numbers=("NCHW", "OIHW", "NCHW")) / r

    for got, f, r in [(out_dx, ddx_f, dx),
                      (out_dx_f, ddx_f, dx),
                      (out_dy_f, ddy_f, dx),
                      (out_lap_f, lap_f, dx * dx)]:
        want = ref(x, f, r)
        assert got.shape == want.shape == (N, 1, H - 2, W - 2)
        assert jnp.allclose(got, want, atol=1e-5, rtol=1e-5), (
            float(jnp.max(jnp.abs(got - want))))

    print("KERNEL_OK")
</pallas_src>

<mosaic_0001>
module attributes {stable_mosaic.version = 11 : i64} {
  func.func @_stencil_kernel(%arg0: i32, %arg1: memref<2x256xf32, #tpu.memory_space<vmem>>, %arg2: memref<2x256xf32, #tpu.memory_space<vmem>>) attributes {dimension_semantics = [#tpu.dimension_semantics<parallel>], iteration_bounds = array<i64: 1>, scalar_prefetch = 0 : i64, scratch_operands = 0 : i64, tpu.core_type = #tpu.core_type<tc>, window_params = [{transform_indices = @transform_0, window_bounds = array<i64: 2, 256>}, {transform_indices = @transform_1, window_bounds = array<i64: 2, 256>}]} {
    %c0 = arith.constant 0 : index
    %c0_0 = arith.constant 0 : index
    %0 = vector.load %arg1[%c0, %c0_0] : memref<2x256xf32, #tpu.memory_space<vmem>>, vector<2x256xf32>
    %c240_i32 = arith.constant 240 : i32
    %1 = tpu.dynamic_rotate %0 by %c240_i32 dim 1 : vector<2x256xf32>, i32 -> vector<2x256xf32>
    %cst = arith.constant -4.000000e+00 : f32
    %2 = vector.broadcast %cst : f32 to vector<2x256xf32>
    %3 = arith.mulf %1, %2 : vector<2x256xf32>
    %c238_i32 = arith.constant 238 : i32
    %4 = tpu.dynamic_rotate %0 by %c238_i32 dim 1 : vector<2x256xf32>, i32 -> vector<2x256xf32>
    %cst_1 = arith.constant 4.000000e+00 : f32
    %5 = vector.broadcast %cst_1 : f32 to vector<2x256xf32>
    %6 = arith.mulf %4, %5 : vector<2x256xf32>
    %7 = arith.addf %3, %6 : vector<2x256xf32>
    %c0_2 = arith.constant 0 : index
    %c0_3 = arith.constant 0 : index
    %8 = vector.load %arg2[%c0_2, %c0_3] : memref<2x256xf32, #tpu.memory_space<vmem>>, vector<2x256xf32>
    tpu.vector_store %arg2[%c0_2, %c0_3], %7 {strides = array<i32>} : memref<2x256xf32, #tpu.memory_space<vmem>>, vector<2x256xf32>,
    return
  }
  func.func @transform_0(%arg0: i32) -> (i32, i32) {
    %c0_i32 = arith.constant 0 : i32
    %c0_i32_0 = arith.constant 0 : i32
    return %arg0, %c0_i32 : i32, i32
  }
  func.func @transform_1(%arg0: i32) -> (i32, i32) {
    %c0_i32 = arith.constant 0 : i32
    %c0_i32_0 = arith.constant 0 : i32
    return %arg0, %c0_i32 : i32, i32
  }
}

</mosaic_0001>

<bundles_post_ra>
// kernel: tpu_custom_call.1
= control target key start
LH: loop header
LB: loop body
LE: loop exit
PB: predicated region body
PF: predicated region fallthrough
CT: control target
= control target key end

     0   :  { %6 = vsyncpa [#allocation3], 0  ;;  %s157_s0 = inlined_call_operand.hbm [shape: f32[2,256], index: 0, kind: input, shape index: {}]   ;;  %s158_s1 = inlined_call_operand.hbm [shape: f32[2,256], index: 1, kind: output, shape index: {}]  }
   0x1   :  { %7 = vsyncpa [#allocation4], 0  ;;  %s13_s8 = sshll.u32 %s157_s0, 4  ;;  %s137_s9 = smov [#allocation2]   ;;  %s14_s8 = int_to_ptr.hbm [resolvable:$true] %s13_s8 }
   0x2   :  { %s15_s10 = sshll.u32 %s137_s9, 4  ;;  %s16_s10 = int_to_ptr.vmem [resolvable:$true] %s15_s10 }
   0x3   :  { %18 = dma.hbm_to_vmem [thread:$0]  %s14_s8, 64, %s16_s10, [#allocation3]  }
   0x4   :  { %133 = dma.done.wait [#allocation3], 64  }
   0x5   :  { %134 = vsyncadd [#allocation3], 4294967232  ;;  %v23_v0 = vld [vmem:[#allocation2] sm:$0xf]  ;;  %s138_s11 = smov 112   ;;  %s139_s12 = smov 110   ;;  %v34_v6 = vlaneseq }
   0x6   :  { %25 = vst [vmem:[#allocation1] ss:$4 sm:$0xff] %v23_v0  ;;  %s140_s0 = smov [#allocation5]   ;;  %s71_s16 = sshll.u32 %s158_s1, 4  ;;  %vm60_vm2 = vcmask 1041408   ;;  %s72_s16 = int_to_ptr.hbm [resolvable:$true] %s71_s16 }
   0x7   :  { %v35_v7 = vand.u32 127, %v34_v6  ;;  %s69_s13 = sshll.u32 %s140_s0, 4  ;;  %s70_s13 = int_to_ptr.vmem [resolvable:$true] %s69_s13 }
   0x9   :  { %vm36_vm0 = vcmp.lt.s32.totalorder %v35_v7, 112  ;;  %vm50_vm1 = vcmp.lt.s32.totalorder %v35_v7, 110 }
   0xd   :  { %v26_v1 = vld.sshfl [vmem:[#allocation1] sm:$0xff pattern:$0x73625140]  ;;  %v27_v2 = vld.sshfl [vmem:[#allocation1 + $0x8] sm:$0xff pattern:$0x73625140] }
   0xe   :  { %30 = vrot.lane.b32.xlu0 %v26_v1, %s138_s11  ;;  %41 = vst [vmem:[#allocation1] ss:$4 sm:$0xff] %v23_v0 }
  0x15   :  { %v42_v3 = vld.sshfl [vmem:[#allocation1] sm:$0xff pattern:$0x73625140]  ;;  %v43_v4 = vld.sshfl [vmem:[#allocation1 + $0x8] sm:$0xff pattern:$0x73625140] }
  0x16   :  { %32 = vrot.lane.b32.xlu0 %v27_v2, %s138_s11  ;;  %46 = vrot.lane.b32.xlu1 %v42_v3, %s139_s12 }
  0x1e   :  { %48 = vrot.lane.b32.xlu1 %v43_v4, %s139_s12 }
  0x80   :  { %v31_v5 = vpop.permute.xlu0 %30 }
  0x88   :  { %v47_v8 = vpop.permute.xlu1 %46  ;;  %v33_v9 = vpop.permute.xlu0 %32 }
  0x89   :  { %v38_v10 = vsel %vm36_vm0, %v33_v9, %v31_v5  ;;  %v37_v12 = vsel %vm36_vm0, %v31_v5, %v33_v9 }
  0x8a   :  { %v40_v15 = vmul.f32 -4.0, %v38_v10  ;;  %v39_v18 = vmul.f32 -4.0, %v37_v12 }
  0x90   :  { %v49_v11 = vpop.permute.xlu1 %48 }
  0x91   :  { %v51_v13 = vsel %vm50_vm1, %v47_v8, %v49_v11  ;;  %v52_v14 = vsel %vm50_vm1, %v49_v11, %v47_v8 }
  0x92   :  { %v53_v16 = vmul.f32 4.0, %v51_v13  ;;  %v54_v17 = vmul.f32 4.0, %v52_v14 }
  0x94   :  { %v56_v19 = vadd.f32 %v54_v17, %v40_v15  ;;  %v55_v20 = vadd.f32 %v53_v16, %v39_v18 }
  0x96   :  { %v59_v21 = vrot.slane %v56_v19, 6 }
  0x98   :  { %v61_v22 = vsel %vm60_vm2, %v55_v20, %v59_v21 }
  0x99   :  { %63 = vst [vmem:[#allocation5] sm:$0xf] %v61_v22 }
  0x9a   :  { %74 = dma.vmem_to_hbm [thread:$0]  %s70_s13, 64, %s72_s16, [#allocation4]  }
  0x9b   :  { %135 = dma.done.wait [#allocation4], 64  }
  0x9c   :  { %136 = vsyncadd [#allocation4], 4294967232 }
  0x9d   :  { %79 = vsyncpa [#allocation3], 1 }
  0x9e   :  { %80 = vsyncpa [#allocation4], 1 }

</bundles_post_ra>
